<compile_context>
chip_gen: v7x
topology: tpu7x:2x2x1
jax: 0.10.0
libtpu: 0.0.40
codegen_flags: <defaults>
</compile_context>

<pallas_src>
import functools

import jax
import jax.numpy as jnp
from jax import lax
from jax.experimental import pallas as pl
from jax.experimental.pallas import tpu as pltpu


def _deepwalk_kernel(vtx_ref, phi_ref, phi_t_ref, out_ref):
    # vtx_ref: (1, N)   phi_ref: (N, D)   phi_t_ref: (D, N)   out_ref: (1, N)
    vtx = vtx_ref[...]                        # (1, N)
    phi = phi_ref[...]                        # (N, D)
    phi_t = phi_t_ref[...]                    # (D, N)  lane-dense (N on lanes)

    # x = vtx @ phi : plain (1, N) x (N, D) -> (1, D)  (natural MXU orientation)
    x = lax.dot_general(
        vtx, phi,
        dimension_numbers=(((1,), (0,)), ((), ())),
        preferred_element_type=jnp.float32,
    )

    # out = phi @ x  ==  x @ phi^T kept as a row: (1, D) x (D, N) -> (1, N)
    out_ref[...] = lax.dot_general(
        x, phi_t,
        dimension_numbers=(((1,), (0,)), ((), ())),
        preferred_element_type=jnp.float32,
    )


@functools.partial(jax.jit, static_argnames=())
def deepwalk_forward(vtx, phi, phi_t):
    """vtx: (N,) f32, phi: (N, D) f32, phi_t: (D, N) f32  ->  (N,) f32."""
    n, _ = phi.shape
    vtx_row = vtx.reshape(1, n)

    out_row = pl.pallas_call(
        _deepwalk_kernel,
        out_shape=jax.ShapeDtypeStruct((1, n), jnp.float32),
        in_specs=[
            pl.BlockSpec(memory_space=pltpu.MemorySpace.VMEM),   # vtx row (1, N)
            pl.BlockSpec(memory_space=pltpu.MemorySpace.VMEM),   # phi    (N, D)
            pl.BlockSpec(memory_space=pltpu.MemorySpace.VMEM),   # phi_t  (D, N)
        ],
        out_specs=pl.BlockSpec(memory_space=pltpu.MemorySpace.VMEM),
    )(vtx_row, phi, phi_t)

    return out_row.reshape(n)


class Model:
    """Mirror of the PyTorch Model: holds phi / phi2 parameters."""

    def __init__(self, num_graph_node, dim, key):
        k1, k2 = jax.random.split(key)
        # torch.rand -> uniform [0, 1)
        self.phi = jax.random.uniform(k1, (num_graph_node, dim), dtype=jnp.float32)
        # Persist the kernel-layout (lane-dense) copy once; never per call.
        self.phi_t = jnp.asarray(self.phi.T)                     # (D, N)
        self.phi2 = jax.random.uniform(k2, (num_graph_node, dim), dtype=jnp.float32)  # unused in forward

    def __call__(self, vtx):
        return deepwalk_forward(vtx, self.phi, self.phi_t)


if __name__ == "__main__":
    key = jax.random.PRNGKey(0)
    k_model, k_vtx = jax.random.split(key)

    num_graph_node = 256   # small synthetic graph size
    dim = 64               # embedding dimension

    model = Model(num_graph_node, dim, k_model)

    # vtx: a (soft) one-hot / feature vector over graph nodes, shape (N,)
    vtx = jax.random.uniform(k_vtx, (num_graph_node,), dtype=jnp.float32)

    out = model(vtx)
    out = jax.block_until_ready(out)

    # Reference check in plain JAX: out = phi @ (vtx @ phi)
    ref = model.phi @ (vtx @ model.phi)
    assert out.shape == (num_graph_node,)
    assert jnp.allclose(out, ref, rtol=1e-5, atol=1e-5)

    print("KERNEL_OK")
</pallas_src>

<mosaic_0001>
module attributes {stable_mosaic.version = 11 : i64} {
  func.func @_deepwalk_kernel(%arg0: memref<1x256xf32, #tpu.memory_space<vmem>>, %arg1: memref<256x64xf32, #tpu.memory_space<vmem>>, %arg2: memref<64x256xf32, #tpu.memory_space<vmem>>, %arg3: memref<1x256xf32, #tpu.memory_space<vmem>>) attributes {dimension_semantics = [], scalar_prefetch = 0 : i64, scratch_operands = 0 : i64, tpu.core_type = #tpu.core_type<tc>} {
    %c0 = arith.constant 0 : index
    %c0_0 = arith.constant 0 : index
    %0 = vector.load %arg0[%c0, %c0_0] : memref<1x256xf32, #tpu.memory_space<vmem>>, vector<1x256xf32>
    %c0_1 = arith.constant 0 : index
    %c0_2 = arith.constant 0 : index
    %1 = vector.load %arg1[%c0_1, %c0_2] : memref<256x64xf32, #tpu.memory_space<vmem>>, vector<256x64xf32>
    %c0_3 = arith.constant 0 : index
    %c0_4 = arith.constant 0 : index
    %2 = vector.load %arg2[%c0_3, %c0_4] : memref<64x256xf32, #tpu.memory_space<vmem>>, vector<64x256xf32>
    %cst = arith.constant dense<0.000000e+00> : vector<1x64xf32>
    %3 = tpu.matmul %0, %1, %cst {dimension_numbers = #tpu.dot_dimension_numbers<[1], [0], [0], [1], [0, 0, 1, 1], [], []>} : vector<1x256xf32>, vector<256x64xf32>, vector<1x64xf32> -> vector<1x64xf32>
    %cst_5 = arith.constant dense<0.000000e+00> : vector<1x256xf32>
    %4 = tpu.matmul %3, %2, %cst_5 {dimension_numbers = #tpu.dot_dimension_numbers<[1], [0], [0], [1], [0, 0, 1, 1], [], []>} : vector<1x64xf32>, vector<64x256xf32>, vector<1x256xf32> -> vector<1x256xf32>
    %c0_6 = arith.constant 0 : index
    %c0_7 = arith.constant 0 : index
    %5 = vector.load %arg3[%c0_6, %c0_7] : memref<1x256xf32, #tpu.memory_space<vmem>>, vector<1x256xf32>
    tpu.vector_store %arg3[%c0_6, %c0_7], %4 {strides = array<i32>} : memref<1x256xf32, #tpu.memory_space<vmem>>, vector<1x256xf32>,
    return
  }
}

</mosaic_0001>

<bundles_post_ra>
// kernel: deepwalk_forward.1
= control target key start
LH: loop header
LB: loop body
LE: loop exit
PB: predicated region body
PF: predicated region fallthrough
CT: control target
= control target key end

     0   :  { %v65_v3 = vlaneseq  ;;  %s557_s0 = inlined_call_operand.vmem [shape: f32[1,256], index: 0, kind: input, shape index: {}]   ;;  %s558_s1 = inlined_call_operand.vmem [shape: f32[256,64], index: 1, kind: input, shape index: {}]   ;;  %s559_s2 = inlined_call_operand.vmem [shape: f32[64,256], index: 2, kind: input, shape index: {}]   ;;  %s560_s3 = inlined_call_operand.hbm [shape: f32[1,256], index: 3, kind: output, shape index: {}]  }
   0x1   :  { %v32_v0 = vld [vmem:[%s558_s1 + $0x80] sm:$0xff]  ;;  %v33_v1 = vld [vmem:[%s558_s1 + $0x88] sm:$0xff]  ;;  %v34_v6 = vld [vmem:[%s558_s1 + $0x90] sm:$0xff] }
   0x2   :  { %v16_v2 = vld [vmem:[%s558_s1] sm:$0xff]  ;;  %v293_v4 = vpack.c.bf16 %v33_v1, %v32_v0  ;;  %v17_v5 = vld [vmem:[%s558_s1 + $0x8] sm:$0xff]  ;;  %v35_v7 = vld [vmem:[%s558_s1 + $0x98] sm:$0xff]  ;;  %v422_v14 = vshrl.u32 %v65_v3, 7 }
   0x3   :  { %v295_v8 = vpack.c.bf16 %v17_v5, %v16_v2  ;;  %v297_v9 = vpack.c.bf16 %v35_v7, %v34_v6  ;;  %v18_v10 = vld [vmem:[%s558_s1 + $0x10] sm:$0xff]  ;;  %v19_v11 = vld [vmem:[%s558_s1 + $0x18] sm:$0xff]  ;;  %v36_v12 = vld [vmem:[%s558_s1 + $0xa0] sm:$0xff] }
   0x4   :  { %294 = vmatprep.subr.bf16.mxu0 %v293_v4  ;;  %v37_v13 = vld [vmem:[%s558_s1 + $0xa8] sm:$0xff]  ;;  %v299_v15 = vpack.c.bf16 %v19_v11, %v18_v10  ;;  %v20_v17 = vld [vmem:[%s558_s1 + $0x20] sm:$0xff]  ;;  %v38_v19 = vld [vmem:[%s558_s1 + $0xb0] sm:$0xff]  ;;  %v71_v21 = vsub.s32 1, %v422_v14 }
   0x5   :  { %296 = vmatpush3.bf16.msra.mxu0 %v295_v8  ;;  %v301_v16 = vpack.c.bf16 %v37_v13, %v36_v12  ;;  %v21_v18 = vld [vmem:[%s558_s1 + $0x28] sm:$0xff]  ;;  %v39_v20 = vld [vmem:[%s558_s1 + $0xb8] sm:$0xff]  ;;  %v22_v24 = vld [vmem:[%s558_s1 + $0x30] sm:$0xff] }
   0x6   :  { %298 = vmatprep.subr.bf16.mxu0 %v297_v9  ;;  %v303_v22 = vpack.c.bf16 %v21_v18, %v20_v17  ;;  %v305_v23 = vpack.c.bf16 %v39_v20, %v38_v19  ;;  %v23_v25 = vld [vmem:[%s558_s1 + $0x38] sm:$0xff]  ;;  %v40_v26 = vld [vmem:[%s558_s1 + $0xc0] sm:$0xff]  ;;  %v41_v27 = vld [vmem:[%s558_s1 + $0xc8] sm:$0xff] }
   0x7   :  { %v15_v28 = vld [vmem:[%s557_s0] sm:$0x3]  ;;  %v25_v30 = vld [vmem:[%s558_s1 + $0x48] sm:$0xff]  ;;  %v51_v33 = vld [vmem:[%s559_s2 + $0x18] sm:$0xff]  ;;  %v307_v35 = vpack.c.bf16 %v23_v25, %v22_v24  ;;  %v309_v40 = vpack.c.bf16 %v41_v27, %v40_v26 }
   0x8   :  { %v24_v29 = vld [vmem:[%s558_s1 + $0x40] sm:$0xff]  ;;  %v72_v31 = vrot.slane %v15_v28, %v71_v21  ;;  %v49_v32 = vld [vmem:[%s559_s2 + $0x8] sm:$0xff]  ;;  %v50_v37 = vld [vmem:[%s559_s2 + $0x10] sm:$0xff] }
   0x9   :  { %300 = vmatpush3.bf16.msra.mxu0 %v299_v15  ;;  %v48_v34 = vld [vmem:[%s559_s2] sm:$0xff]  ;;  %v325_v36 = vpack.c.bf16 %v51_v33, %v49_v32  ;;  %v53_v38 = vld [vmem:[%s559_s2 + $0x28] sm:$0xff]  ;;  %v55_v39 = vld [vmem:[%s559_s2 + $0x38] sm:$0xff] }
   0xa   :  { %302 = vmatprep.subr.bf16.mxu0 %v301_v16  ;;  %139 = vmatprep.mubr.f32.mxu0 %v72_v31  ;;  %v327_v41 = vpack.c.bf16 %v50_v37, %v48_v34  ;;  %v329_v42 = vpack.c.bf16 %v55_v39, %v53_v38  ;;  %v52_v43 = vld [vmem:[%s559_s2 + $0x20] sm:$0xff]  ;;  %v54_v44 = vld [vmem:[%s559_s2 + $0x30] sm:$0xff]  ;;  %v57_v45 = vld [vmem:[%s559_s2 + $0x48] sm:$0xff] }
   0xb   :  { %v42_v46 = vld [vmem:[%s558_s1 + $0xd0] sm:$0xff]  ;;  %v43_v47 = vld [vmem:[%s558_s1 + $0xd8] sm:$0xff]  ;;  %326 = vmatprep.subr.bf16.mxu1 %v325_v36  ;;  %v331_v49 = vpack.c.bf16 %v54_v44, %v52_v43 }
   0xc   :  { %v59_v48 = vld [vmem:[%s559_s2 + $0x58] sm:$0xff]  ;;  %328 = vmatpush1.bf16.msra.mxu1 %v327_v41 }
   0xd   :  { %304 = vmatpush3.bf16.msra.mxu0 %v303_v22 }
   0xe   :  { %306 = vmatprep.subr.bf16.mxu0 %v305_v23 }
   0xf   :  { %8 = vsyncpa [#allocation3], 0  ;;  %v311_v50 = vpack.c.bf16 %v25_v30, %v24_v29  ;;  %330 = vmatprep.subr.bf16.mxu1 %v329_v42  ;;  %v333_v51 = vpack.c.bf16 %v59_v48, %v57_v45  ;;  %v56_v52 = vld [vmem:[%s559_s2 + $0x40] sm:$0xff]  ;;  %v58_v53 = vld [vmem:[%s559_s2 + $0x50] sm:$0xff]  ;;  %v313_v54 = vpack.c.bf16 %v43_v47, %v42_v46  ;;  %v67_v7 = vsub.s32 0, %v422_v14  ;;  %s370_s26 = smov [#allocation2]  }
  0x10   :  { %v26_v55 = vld [vmem:[%s558_s1 + $0x50] sm:$0xff]  ;;  %v27_v56 = vld [vmem:[%s558_s1 + $0x58] sm:$0xff]  ;;  %v44_v57 = vld [vmem:[%s558_s1 + $0xe0] sm:$0xff]  ;;  %332 = vmatpush1.bf16.msra.mxu1 %v331_v49  ;;  %v335_v59 = vpack.c.bf16 %v58_v53, %v56_v52  ;;  %v368_v17 = vmov 0.0   ;;  %vm145_vm0 = vcmask 523264   ;;  %vm240_vm1 = vcmp.lt.s32.totalorder %v65_v3, 256 }
  0x11   :  { %308 = vmatpush3.bf16.msra.mxu0 %v307_v35  ;;  %v45_v58 = vld [vmem:[%s558_s1 + $0xe8] sm:$0xff]  ;;  %v315_v60 = vpack.c.bf16 %v27_v56, %v26_v55  ;;  %334 = vmatprep.subr.bf16.mxu1 %v333_v51  ;;  %v28_v62 = vld [vmem:[%s558_s1 + $0x60] sm:$0xff]  ;;  %v46_v0 = vld [vmem:[%s558_s1 + $0xf0] sm:$0xff]  ;;  %v68_v9 = vrot.slane %v15_v28, %v67_v7  ;;  %v369_v21 = vmov 1966171168  }
  0x12   :  { %310 = vmatprep.subr.bf16.mxu0 %v309_v40  ;;  %v317_v61 = vpack.c.bf16 %v45_v58, %v44_v57  ;;  %v29_v63 = vld [vmem:[%s558_s1 + $0x68] sm:$0xff]  ;;  %v47_v1 = vld [vmem:[%s558_s1 + $0xf8] sm:$0xff]  ;;  %v30_v5 = vld [vmem:[%s558_s1 + $0x70] sm:$0xff]  ;;  %213 = vmatprep.mubr.f32.mxu1 %v368_v17  ;;  %v224_v22 = vunpack.c.l.s4 %v369_v21 }
  0x13   :  { %v319_v2 = vpack.c.bf16 %v29_v63, %v28_v62  ;;  %v321_v4 = vpack.c.bf16 %v47_v1, %v46_v0  ;;  %v31_v6 = vld [vmem:[%s558_s1 + $0x78] sm:$0xff]  ;;  %v61_v10 = vld [vmem:[%s559_s2 + $0x68] sm:$0xff]  ;;  %v60_v13 = vld [vmem:[%s559_s2 + $0x60] sm:$0xff] }
  0x14   :  { %336 = vmatpush1.bf16.msra.mxu1 %v335_v59  ;;  %v323_v8 = vpack.c.bf16 %v31_v6, %v30_v5  ;;  %v63_v11 = vld [vmem:[%s559_s2 + $0x78] sm:$0xff]  ;;  %v62_v15 = vld [vmem:[%s559_s2 + $0x70] sm:$0xff]  ;;  %v225_v23 = vunpack.c.0.s8 %v224_v22  ;;  %s249_s2 = sshll.u32 %s370_s26, 4  ;;  %s250_s2 = int_to_ptr.vmem [resolvable:$true] %s249_s2 }
  0x15   :  { %312 = vmatpush3.bf16.msra.mxu0 %v311_v50  ;;  %v337_v12 = vpack.c.bf16 %v63_v11, %v61_v10  ;;  %v339_v16 = vpack.c.bf16 %v62_v15, %v60_v13  ;;  %s344_s27 = scalar_lea.vmem %s250_s2, 32  ;;  %p349_p1 = scmp.lt.s32.totalorder %s250_s2, %s250_s2 }
  0x16   :  { %314 = vmatprep.subr.bf16.mxu0 %v313_v54  ;;  %v228_v25 = vsub.s32 %v225_v23, %v422_v14  ;;  %p345_p0 = scmp.ne.s32.totalorder %s250_s2, %s344_s27  ;;  %p350_p2 = scmp.lt.s32.totalorder %s344_s27, %s344_s27 }
  0x17   :  { %338 = vmatprep.subr.bf16.mxu1 %v337_v12 }
  0x18   :  { %340 = vmatpush1.bf16.msra.mxu1 %v339_v16  ;;  %p351_p3 = por %p350_p2, %p349_p1 }
  0x19   :  { %316 = vmatpush3.bf16.msra.mxu0 %v315_v60 }
  0x1a   :  { %318 = vmatprep.subr.bf16.mxu0 %v317_v61  ;;  %p352_p4 = pnand %p351_p3, %p345_p0 }
  0x1d   :  { %320 = vmatpush3.bf16.msra.mxu0 %v319_v2 }
  0x1e   :  { %322 = vmatprep.subr.bf16.mxu0 %v321_v4 }
  0x21   :  { %324 = vmatpush3.bf16.msra.mxu0 %v323_v8 }
  0x24   :  { %140 = vmatmul.mubr.f32.vlgmr.msra.gmra.mrb[0].mxu0 %v68_v9 }
  0xf7   :  { %v290_v18 = vpop.f32.mrb[0].mxu0 }
  0xf8   :  { %v291_v19 = vpop.f32.mrb[1].mxu0 }
  0xf9   :  { %v292_v20 = vadd.f32 %v291_v19, %v290_v18 }
  0xfb   :  { %257 = vmatmul.mubr.msk.f32.vlgmr.msra.gmra.mrb[0].mxu1 %vm145_vm0, %v292_v20 }
 0x1ce   :  { %v215_v24 = vpop.f32.mrb[0].mxu1 }
 0x1cf   :  { %v217_v26 = vpop.f32.mrb[1].mxu1 }
 0x1d0   :  { %v222_v27 = vcombine.low %v215_v24, %v217_v26 }
 0x1d2   :  { %v229_v28 = vrot.slane %v222_v27, %v228_v25 }
 0x1d4   :  { %v236_v29 = vrot.slane %v229_v28, %v228_v25 }
 0x1d6   :  { %242 = vst.msk [vmem:[#allocation2] sm:$0x3] %vm240_vm1, %v236_v29 }
 0x1d7   :  { %355 = shalt.err (!%p352_p4)
}
 0x1d8   :  { %s356_s30 = scalar_lea.hbm %s560_s3, 32 }
 0x1d9   :  { %p357_p5 = scmp.ne.s32.totalorder %s560_s3, %s356_s30  ;;  %p360_p6 = scmp.lt.u32.totalorder %s356_s30, %s560_s3 }
 0x1db   :  { %p362_p7 = pnand %p360_p6, %p357_p5 }
 0x1dd   :  { %365 = shalt.err (!%p362_p7)
}
 0x1de   :  { %252 = dma.vmem_to_hbm [thread:$0]  %s250_s2, 32, %s560_s3, [#allocation3]  }
 0x1df   :  { %366 = dma.done.wait [#allocation3], 32  }
 0x1e0   :  { %367 = vsyncadd [#allocation3], 4294967264 }
 0x1e1   :  { %256 = vsyncpa [#allocation3], 1 }

</bundles_post_ra>
